<compile_context>
chip_gen: v7x
topology: tpu7x:2x2x1
jax: 0.10.0
libtpu: 0.0.40
codegen_flags: <defaults>
</compile_context>

<pallas_src>
import functools

import jax
import jax.numpy as jnp
from jax.experimental import pallas as pl
from jax.experimental.pallas import tpu as pltpu


_SMALL_BATCH_MAX = 128            # grid-less path for B <= this


def _round_up(x, m):
    return ((x + m - 1) // m) * m


def _tpu_device_kind():
    try:
        return jax.devices()[0].device_kind.lower()
    except Exception:
        return ""


# ---------------------------------------------------------------------------
# Parameter packing (done once, outside the per-step call).
# ---------------------------------------------------------------------------
def pack_actor_params(w1, b1, w2, b2):
    """Pack ActorNetwork parameters into kernel-friendly slabs.

    Expected layouts (transposed relative to PyTorch nn.Linear):
      w1: (state_dim, hidden)   == fc1.weight.T
      b1: (hidden,) or (1, hidden)
      w2: (hidden, action_dim)  == fc2.weight.T
      b2: (action_dim,)
    """
    S, H = w1.shape
    A = w2.shape[1]
    f32 = jnp.float32
    w1 = w1.astype(f32)
    b1_row = jnp.reshape(b1, (1, H)).astype(f32)
    w2 = w2.astype(f32)
    b2_vec = jnp.reshape(b2, (A,)).astype(f32)
    b2_row = jnp.zeros((1, H), f32).at[0, :A].set(b2_vec)

    # Small path: one VMEM slab -> one input DMA for all parameters.
    small_slab = jnp.concatenate([w1, b1_row, w2.T, b2_row], axis=0)  # (S+1+A+1, H)
    # Batched path: feature-major slab, resident across the batch grid.
    big_slab = jnp.concatenate([w1.T, b1_row.T, w2], axis=1)          # (H, S+1+A)
    return {"small_slab": small_slab, "big_slab": big_slab, "b2": b2_vec}


# ---------------------------------------------------------------------------
# Small-batch kernel: single grid-less invocation, 2 input DMAs + 1 output.
# x: (B, S) VMEM, p: (S+1+A+1, H) VMEM packed slab, o: (B, A) VMEM.
# ---------------------------------------------------------------------------
def _actor_kernel_small(x_ref, p_ref, o_ref):
    x = x_ref[...]
    S = x.shape[1]
    A = o_ref.shape[1]

    # Layer 1 on the VPU (S == 2 -> two FMAs); hidden stays (B, H).
    h = p_ref[S:S + 1, :]                          # b1 row, broadcasts over B
    for s in range(S):                             # fully unrolled, S tiny
        h = h + x[:, s:s + 1] * p_ref[s:s + 1, :]
    h = jnp.maximum(h, 0.0)

    # Layer 2 as a lane (last-axis) reduction per output column; direct store.
    for a in range(A):
        w2a = p_ref[S + 1 + a:S + 2 + a, :]        # (1, H)
        b2a = p_ref[S + 1 + A:S + 2 + A, a:a + 1]  # (1, 1)
        ya = jnp.sum(h * w2a, axis=-1, keepdims=True) + b2a
        o_ref[:, a:a + 1] = jnp.tanh(ya).astype(o_ref.dtype)


def _actor_forward_small(state, params):
    B = state.shape[0]
    A = params["b2"].shape[0]
    vmem = pltpu.MemorySpace.VMEM
    return pl.pallas_call(
        _actor_kernel_small,
        out_shape=jax.ShapeDtypeStruct((B, A), jnp.float32),
        in_specs=[
            pl.BlockSpec(memory_space=vmem),   # state (B, S)
            pl.BlockSpec(memory_space=vmem),   # packed parameter slab
        ],
        out_specs=pl.BlockSpec(memory_space=vmem),
    )(state.astype(jnp.float32), params["small_slab"])


# ---------------------------------------------------------------------------
# Large-batch kernel: batch tiled, transposed layout (batch on the 128-lane
# axis), layer1 + ReLU + layer2 fused over H-chunks so the (H, TB) hidden
# activation never exists.
# xt: (S, TB), p: (H, S+1+A) [w1^T | b1 | w2], b2: (A,) SMEM, o: (A, TB).
# ---------------------------------------------------------------------------
def _actor_kernel_batched(xt_ref, p_ref, b2_ref, o_ref, *, chunk):
    S, _TB = xt_ref.shape
    H = p_ref.shape[0]
    A = o_ref.shape[0]
    C = chunk
    n_chunks = H // C

    xt = xt_ref[...]                               # (S, TB), tiny; load once
    x_rows = [xt[s:s + 1, :] for s in range(S)]    # (1, TB) sublane rows

    def body(c, accs):
        r0 = pl.multiple_of(c * C, C)
        pc = p_ref[pl.ds(r0, C), :]                # (C, S+1+A) param chunk
        # Layer 1 for this chunk of hidden units, fused with ReLU.
        hc = pc[:, S:S + 1]                        # b1 chunk, (C, 1)
        for s in range(S):
            hc = hc + pc[:, s:s + 1] * x_rows[s]   # (C,1)*(1,TB) FMA
        hc = jnp.maximum(hc, 0.0)                  # (C, TB): a few vregs only
        # Layer 2 partial sums (sublane reduction), accumulated per out row.
        return tuple(
            accs[a] + jnp.sum(hc * pc[:, S + 1 + a:S + 2 + a],
                              axis=0, keepdims=True)
            for a in range(A))

    acc0 = tuple(jnp.zeros((1, xt.shape[1]), jnp.float32) for _ in range(A))
    accs = jax.lax.fori_loop(0, n_chunks, body, acc0)

    for a in range(A):                             # direct lane-dense stores
        o_ref[a:a + 1, :] = jnp.tanh(accs[a] + b2_ref[a]).astype(o_ref.dtype)


def _choose_batch_tile(B, requested=None):
    if requested is not None:
        return _round_up(max(128, requested), 128)
    if "v7" in _tpu_device_kind():
        # 2 TensorCores: ensure >= 2 balanced ("parallel",) grid steps.
        return min(512, max(128, _round_up(pl.cdiv(B, 2), 128)))
    # Single TensorCore (v5e / v6e): grid is a serial loop (~0.35 us/step),
    # prefer one big step; in-kernel H-chunk fusion bounds vreg pressure.
    return min(1024, _round_up(B, 128))


def _actor_forward_batched(state, params, batch_tile=None):
    B, S = state.shape
    big_slab = params["big_slab"]
    b2 = params["b2"]
    H = big_slab.shape[0]
    A = b2.shape[0]

    TB = _choose_batch_tile(B, batch_tile)
    PB = _round_up(B, TB)                          # padded batch
    grid = (PB // TB,)

    # Layout plumbing: feature-major (S, PB) input so batch sits on the
    # 128-lane axis and the (A, PB) output is written with unmasked,
    # lane-dense stores.  S and A are tiny so this is cheap.
    # TODO(synk): keep activations feature-major across the whole RL pipeline
    # to drop this pad/transpose entirely.
    x = state.astype(jnp.float32)
    if PB != B:
        x = jnp.pad(x, ((0, PB - B), (0, 0)))
    xt = x.T                                       # (S, PB)

    chunk = next(c for c in (16, 8, 4, 2, 1) if H % c == 0)
    kernel = functools.partial(_actor_kernel_batched, chunk=chunk)

    out_t = pl.pallas_call(
        kernel,
        out_shape=jax.ShapeDtypeStruct((A, PB), jnp.float32),
        grid=grid,
        in_specs=[
            pl.BlockSpec((S, TB), lambda i: (0, i)),                 # batch tile
            pl.BlockSpec((H, big_slab.shape[1]), lambda i: (0, 0)),  # resident params
            pl.BlockSpec(memory_space=pltpu.MemorySpace.SMEM),       # b2 scalars
        ],
        out_specs=pl.BlockSpec((A, TB), lambda i: (0, i)),           # lane-dense
        compiler_params=pltpu.CompilerParams(
            dimension_semantics=("parallel",),
        ),
    )(xt, big_slab, b2)

    out_t = out_t[:, :B]                           # drop batch padding
    if A == 1:
        return out_t.reshape(B, 1)                 # free: (1, B) -> (B, 1)
    return out_t.T


# ---------------------------------------------------------------------------
# Public wrapper.
# ---------------------------------------------------------------------------
def actor_forward(state, params, *, batch_tile=None):
    """ActorNetwork forward: state (B, state_dim) f32 -> (B, action_dim) f32."""
    B = state.shape[0]
    if B <= _SMALL_BATCH_MAX and batch_tile is None:
        return _actor_forward_small(state, params)
    return _actor_forward_batched(state, params, batch_tile)


def init_params(key, state_dim, action_dim, hidden_dim):
    """PyTorch nn.Linear default init: U[-1/sqrt(fan_in), 1/sqrt(fan_in)],
    returned in the transposed-vs-PyTorch layout pack_actor_params expects."""
    k1, k2, k3, k4 = jax.random.split(key, 4)
    bound1 = 1.0 / jnp.sqrt(jnp.float32(state_dim))
    bound2 = 1.0 / jnp.sqrt(jnp.float32(hidden_dim))
    w1 = jax.random.uniform(k1, (state_dim, hidden_dim), jnp.float32, -bound1, bound1)
    b1 = jax.random.uniform(k2, (hidden_dim,), jnp.float32, -bound1, bound1)
    w2 = jax.random.uniform(k3, (hidden_dim, action_dim), jnp.float32, -bound2, bound2)
    b2 = jax.random.uniform(k4, (action_dim,), jnp.float32, -bound2, bound2)
    return w1, b1, w2, b2


def reference_forward(state, w1, b1, w2, b2):
    h = jnp.maximum(state @ w1 + b1, 0.0)
    return jnp.tanh(h @ w2 + b2)


if __name__ == "__main__":
    # Watertank task: state_dim = 2 (observation_spec), action_dim = 1
    # (action_spec), hidden_dim = 128.
    state_dim, action_dim, hidden_dim = 2, 1, 128

    key = jax.random.PRNGKey(0)
    kp, kx_small, kx_big = jax.random.split(key, 3)
    w1, b1, w2, b2 = init_params(kp, state_dim, action_dim, hidden_dim)
    params = pack_actor_params(w1, b1, w2, b2)

    # Small batch (the RL inference case): grid-less kernel, 2 input DMAs.
    batch = 8
    state = jax.random.uniform(kx_small, (batch, state_dim), jnp.float32, 0.0, 2.0)
    out = jax.block_until_ready(actor_forward(state, params))
    ref = reference_forward(state, w1, b1, w2, b2)
    assert out.shape == (batch, action_dim)
    assert jnp.allclose(out, ref, atol=1e-5, rtol=1e-5)

    # Larger, NON-multiple batch: padded, batch-tiled, fused-over-H kernel
    # (exercises the remainder-handling fix and lane-dense writeback).
    big_batch = 300
    state_big = jax.random.uniform(kx_big, (big_batch, state_dim), jnp.float32, 0.0, 2.0)
    out_big = jax.block_until_ready(actor_forward(state_big, params))
    ref_big = reference_forward(state_big, w1, b1, w2, b2)
    assert out_big.shape == (big_batch, action_dim)
    assert jnp.allclose(out_big, ref_big, atol=1e-5, rtol=1e-5)

    print("KERNEL_OK")
</pallas_src>

<mosaic_0001>
module attributes {stable_mosaic.version = 11 : i64} {
  func.func @_actor_kernel_small(%arg0: memref<8x2xf32, #tpu.memory_space<vmem>>, %arg1: memref<5x128xf32, #tpu.memory_space<vmem>>, %arg2: memref<8x1xf32, #tpu.memory_space<vmem>>) attributes {dimension_semantics = [], scalar_prefetch = 0 : i64, scratch_operands = 0 : i64, tpu.core_type = #tpu.core_type<tc>} {
    %c0 = arith.constant 0 : index
    %c0_0 = arith.constant 0 : index
    %0 = vector.load %arg0[%c0, %c0_0] : memref<8x2xf32, #tpu.memory_space<vmem>>, vector<8x2xf32>
    %c2 = arith.constant 2 : index
    %c0_1 = arith.constant 0 : index
    %1 = vector.load %arg1[%c2, %c0_1] : memref<5x128xf32, #tpu.memory_space<vmem>>, vector<1x128xf32>
    %2 = vector.extract_strided_slice %0 {offsets = [0, 0], sizes = [8, 1], strides = [1, 1]} : vector<8x2xf32> to vector<8x1xf32>
    %c0_2 = arith.constant 0 : index
    %c0_3 = arith.constant 0 : index
    %3 = vector.load %arg1[%c0_2, %c0_3] : memref<5x128xf32, #tpu.memory_space<vmem>>, vector<1x128xf32>
    %4 = vector.broadcast %2 : vector<8x1xf32> to vector<8x128xf32>
    %5 = vector.broadcast %3 : vector<1x128xf32> to vector<8x128xf32>
    %6 = arith.mulf %4, %5 : vector<8x128xf32>
    %7 = vector.broadcast %1 : vector<1x128xf32> to vector<8x128xf32>
    %8 = arith.addf %7, %6 : vector<8x128xf32>
    %9 = vector.extract_strided_slice %0 {offsets = [0, 1], sizes = [8, 1], strides = [1, 1]} : vector<8x2xf32> to vector<8x1xf32>
    %c1 = arith.constant 1 : index
    %c0_4 = arith.constant 0 : index
    %10 = vector.load %arg1[%c1, %c0_4] : memref<5x128xf32, #tpu.memory_space<vmem>>, vector<1x128xf32>
    %11 = vector.broadcast %9 : vector<8x1xf32> to vector<8x128xf32>
    %12 = vector.broadcast %10 : vector<1x128xf32> to vector<8x128xf32>
    %13 = arith.mulf %11, %12 : vector<8x128xf32>
    %14 = arith.addf %8, %13 : vector<8x128xf32>
    %cst = arith.constant 0.000000e+00 : f32
    %15 = vector.broadcast %cst : f32 to vector<8x128xf32>
    %16 = arith.maximumf %14, %15 : vector<8x128xf32>
    %c3 = arith.constant 3 : index
    %c0_5 = arith.constant 0 : index
    %17 = vector.load %arg1[%c3, %c0_5] : memref<5x128xf32, #tpu.memory_space<vmem>>, vector<1x128xf32>
    %c4 = arith.constant 4 : index
    %c0_6 = arith.constant 0 : index
    %18 = vector.load %arg1[%c4, %c0_6] : memref<5x128xf32, #tpu.memory_space<vmem>>, vector<1x1xf32>
    %19 = vector.broadcast %17 : vector<1x128xf32> to vector<8x128xf32>
    %20 = arith.mulf %16, %19 : vector<8x128xf32>
    %cst_7 = arith.constant dense<0.000000e+00> : vector<8xf32>
    %21 = vector.multi_reduction <add>, %20, %cst_7 [1] : vector<8x128xf32> to vector<8xf32>
    %22 = vector.shape_cast %21 : vector<8xf32> to vector<8x1xf32>
    %23 = vector.broadcast %18 : vector<1x1xf32> to vector<8x1xf32>
    %24 = arith.addf %22, %23 : vector<8x1xf32>
    %25 = math.tanh %24 : vector<8x1xf32>
    %c0_8 = arith.constant 0 : index
    %c0_9 = arith.constant 0 : index
    %26 = vector.load %arg2[%c0_8, %c0_9] : memref<8x1xf32, #tpu.memory_space<vmem>>, vector<8x1xf32>
    tpu.vector_store %arg2[%c0_8, %c0_9], %25 {strides = array<i32>} : memref<8x1xf32, #tpu.memory_space<vmem>>, vector<8x1xf32>,
    return
  }
}

</mosaic_0001>

<bundles_post_ra>
// kernel: tpu_custom_call.1
= control target key start
LH: loop header
LB: loop body
LE: loop exit
PB: predicated region body
PF: predicated region fallthrough
CT: control target
= control target key end

     0   :  { %v73_v0 = vmov 0   ;;  %v74_v2 = vmov 1   ;;  %vm56_vm0 = vcmask 7168   ;;  %s111_s0 = inlined_call_operand.vmem [shape: f32[8,2], index: 0, kind: input, shape index: {}]   ;;  %s112_s1 = inlined_call_operand.vmem [shape: f32[5,128], index: 1, kind: input, shape index: {}]   ;;  %s113_s2 = inlined_call_operand.vmem [shape: f32[8,1], index: 2, kind: output, shape index: {}]  }
   0x1   :  { %69 = vset.pattern.permute.xlu0 %v73_v0  ;;  %v11_v1 = vld [vmem:[%s111_s0] sm:$0xff] }
   0x2   :  { %16 = vperm.xlu0 %69, %v11_v1   ;;  %v62_v3 = vld [vmem:[%s112_s1] ss:$0 sm:$0xff]  ;;  %v63_v6 = vld [vmem:[%s112_s1 + $0x2] ss:$0 sm:$0xff]  ;;  %v64_v7 = vld [vmem:[%s112_s1 + $0x1] ss:$0 sm:$0xff] }
   0x3   :  { %v65_v12 = vld [vmem:[%s112_s1 + $0x3] ss:$0 sm:$0xff]  ;;  %v66_v15 = vld [vmem:[%s112_s1 + $0x4] ss:$0 sm:$0xff] }
   0x6   :  { %70 = vset.pattern.permute.xlu0 %v74_v2 }
   0x7   :  { %31 = vperm.xlu0 %70, %v11_v1  }
  0x81   :  { %v17_v4 = vpop.permute.xlu0 %16 }
  0x82   :  { %v23_v5 = vmul.f32 %v62_v3, %v17_v4 }
  0x84   :  { %v28_v9 = vadd.f32 %v63_v6, %v23_v5 }
  0x86   :  { %v32_v8 = vpop.permute.xlu0 %31 }
  0x87   :  { %v38_v10 = vmul.f32 %v64_v7, %v32_v8 }
  0x89   :  { %v39_v11 = vadd.f32 %v38_v10, %v28_v9 }
  0x8b   :  { %v40_v13 = vmax.f32 %v39_v11, 0.0 }
  0x8d   :  { %v47_v14 = vmul.f32 %v65_v12, %v40_v13 }
  0x8f   :  { %48 = vadd.xlane.f32.xlu1 %v47_v14 }
 0x11c   :  { %v49_v16 = vpop.xlane.xlu1 %48 }
 0x11d   :  { %v54_v17 = vadd.f32 %v66_v15, %v49_v16 }
 0x11f   :  { %71 = vtanh.f32 %v54_v17 }
 0x129   :  { %v72_v18 = vpop.eup %71 }
 0x12a   :  { %57 = vst.msk [vmem:[%s113_s2] sm:$0xff] %vm56_vm0, %v72_v18 }

</bundles_post_ra>
